<compile_context>
chip_gen: v7x
topology: tpu7x:2x2x1
jax: 0.10.0
libtpu: 0.0.40
codegen_flags: <defaults>
</compile_context>

<pallas_src>
import functools

import jax
import jax.numpy as jnp
from jax.experimental import pallas as pl


# ----------------------------- Pallas kernel -------------------------------

def _full_spec(shape):
    # Whole-array blocks (gridless call): block == full array, always legal
    # w.r.t. the (8,128) rule.  At N=16 a grid would be pure overhead.
    return pl.BlockSpec(shape, lambda: (0,) * len(shape))


def _align8(n):
    return (n + 7) & ~7


def _gene_encoder_kernel(a2_ref, x_ref, p_ref, flat_ref, out_ref, *,
                         n, f_in, hidden, num_subvertices, offsets):
    f32 = jnp.float32
    o_w1, o_w2, o_w3, o_b = offsets
    num_groups = n // num_subvertices

    # ---- unpack the single parameter slab (static, sublane-aligned slices) --
    w1 = p_ref[o_w1:o_w1 + f_in, :]                          # (f_in, H)
    w2 = p_ref[o_w2:o_w2 + hidden, :]                        # (H, H)
    w3 = p_ref[o_w3:o_w3 + num_subvertices * hidden, :]      # (S*H, H)
    b1 = p_ref[o_b + 0:o_b + 1, :]
    b2 = p_ref[o_b + 1:o_b + 2, :]
    b3 = p_ref[o_b + 2:o_b + 3, :]

    a = a2_ref[0:n, :]          # Â in original node order        (layer 1)
    a_r = a2_ref[n:2 * n, :]    # Â with rows in s-major order    (layer 2)
    x = x_ref[...]

    # ---- GCN layer 1 (+ ReLU):  H1 = relu(Â X W1 + b1) ----------------------
    h1 = jnp.dot(a, jnp.dot(x, w1, preferred_element_type=f32),
                 preferred_element_type=f32)
    h1 = jnp.maximum(h1 + b1, 0.0)

    # ---- GCN layer 2: rows come out pre-permuted into flatten order ---------
    # h2r[s*G + g, :] == H2[g*S + s, :]
    h2r = jnp.dot(a_r, jnp.dot(h1, w2, preferred_element_type=f32),
                  preferred_element_type=f32) + b2           # (N, H)

    # ---- group-flatten: fill the lane-dense (G, S*H) embedding slab ---------
    # flat[g, s*H:(s+1)*H] = H2[g*S + s, :]  ==  h2r[s*G + g, :]
    for s in range(num_subvertices):                         # unrolled, tiny
        flat_ref[:, s * hidden:(s + 1) * hidden] = (
            h2r[s * num_groups:(s + 1) * num_groups, :].astype(flat_ref.dtype))

    # ---- Linear: ONE (G, S*H) @ (S*H, H) matmul ------------------------------
    flat = flat_ref[...].astype(f32)
    out = jnp.dot(flat, w3, preferred_element_type=f32) + b3
    out_ref[...] = out.astype(out_ref.dtype)


def gene_encoder_forward(a2, x, params, *, f_in, hidden, num_subvertices,
                         offsets):
    n = x.shape[0]
    assert n % num_subvertices == 0, (
        "number of nodes must be divisible by num_subvertices")
    num_groups = n // num_subvertices
    n_out = hidden                                  # Linear(S*H -> H)

    kernel = functools.partial(
        _gene_encoder_kernel, n=n, f_in=f_in, hidden=hidden,
        num_subvertices=num_subvertices, offsets=offsets)

    flat, out = pl.pallas_call(
        kernel,
        out_shape=(
            jax.ShapeDtypeStruct((num_groups, num_subvertices * hidden),
                                 jnp.float32),
            jax.ShapeDtypeStruct((num_groups, n_out), jnp.float32)),
        in_specs=[_full_spec(a2.shape),
                  _full_spec((n, f_in)),
                  _full_spec(params.shape)],
        out_specs=(_full_spec((num_groups, num_subvertices * hidden)),
                   _full_spec((num_groups, n_out))),
    )(a2, x, params)

    # flat is exactly view(H2, [G, S*H]); undoing that view recovers the
    # per-node embeddings.  This reshape is wrapper-side layout plumbing.
    embeddings = flat.reshape(n, hidden)
    return out, embeddings


# ----------------------------- Glue (plain JAX) ----------------------------

def gcn_normalized_adjacency(edge_index, num_nodes):
    """Dense Â = D^{-1/2} (A + I) D^{-1/2} from a [2, E] edge_index."""
    src, dst = edge_index[0], edge_index[1]
    a = jnp.zeros((num_nodes, num_nodes), jnp.float32)
    # messages flow source -> target: row = target, col = source.
    a = a.at[dst, src].add(1.0)
    a = a + jnp.eye(num_nodes, dtype=jnp.float32)            # self-loops
    deg = a.sum(axis=1)
    d_inv_sqrt = jnp.where(deg > 0, 1.0 / jnp.sqrt(deg), 0.0)
    return d_inv_sqrt[:, None] * a * d_inv_sqrt[None, :]


def _pack_params(w1, w2, w3, b1, b2, b3):
    """Pack every parameter into one (rows, hidden) slab -> a single DMA."""
    hidden = w1.shape[1]
    bias = jnp.stack([b1, b2, b3])                           # (3, hidden)
    blocks = [w1, w2, w3, bias]
    offsets, r = [], 0
    for blk in blocks:
        offsets.append(r)
        r = _align8(r + blk.shape[0])                        # sublane-align
    slab = jnp.zeros((r, hidden), jnp.float32)
    for blk, off in zip(blocks, offsets):
        slab = slab.at[off:off + blk.shape[0], :].set(blk.astype(jnp.float32))
    return slab, tuple(offsets)


def _reference_forward(a_hat, x, w1, b1, w2, b2, w3, b3, num_subvertices):
    """Pure-JAX reference of GeneEncoder.forward for correctness checking."""
    h = jnp.maximum(a_hat @ (x @ w1) + b1, 0.0)
    h = a_hat @ (h @ w2) + b2
    flat = h.reshape(h.shape[0] // num_subvertices,
                     num_subvertices * h.shape[1])
    return flat @ w3 + b3, h


class GeneEncoderPallas:
    """Deterministically-initialized JAX/Pallas port of GeneEncoder.forward."""

    def __init__(self, num_features, hidden_dim, num_vertices, num_subvertices,
                 dropout=0.2, is_training=False, key=None):
        if key is None:
            key = jax.random.PRNGKey(42)     # created per-instance (no shared
                                             # mutable default argument)
        self.num_vertices = num_vertices
        self.num_subvertices = num_subvertices
        self.hidden_dim = hidden_dim
        k1, k2, k3 = jax.random.split(key, 3)

        def glorot(k, shape):
            fan_in, fan_out = shape
            lim = jnp.sqrt(6.0 / (fan_in + fan_out))
            return jax.random.uniform(k, shape, jnp.float32, -lim, lim)

        # GCNConv(num_features -> hidden_dim)
        self.w1 = glorot(k1, (num_features, hidden_dim))
        self.b1 = jnp.zeros((hidden_dim,), jnp.float32)
        # GCNConv(hidden_dim -> hidden_dim)
        self.w2 = glorot(k2, (hidden_dim, hidden_dim))
        self.b2 = jnp.zeros((hidden_dim,), jnp.float32)
        # Linear(num_subvertices * hidden_dim -> hidden_dim)
        self.w3 = glorot(k3, (num_subvertices * hidden_dim, hidden_dim))
        self.b3 = jnp.zeros((hidden_dim,), jnp.float32)

        # One packed parameter slab -> one input DMA instead of four/six.
        self.params, self.offsets = _pack_params(
            self.w1, self.w2, self.w3, self.b1, self.b2, self.b3)
        # TODO(synk): dropout is declared in the torch module but never applied
        # in forward(), so it is intentionally omitted here.

        self._a_hat = None
        self._a2 = None          # cached [Â ; Â_perm] (static graph)
        self._forward = jax.jit(functools.partial(
            gene_encoder_forward,
            f_in=num_features, hidden=hidden_dim,
            num_subvertices=num_subvertices, offsets=self.offsets))

    def set_graph(self, edge_index, num_nodes):
        """Precompute & cache Â and its row-permuted copy for a static graph."""
        assert num_nodes % self.num_subvertices == 0
        a_hat = gcn_normalized_adjacency(edge_index, num_nodes)
        num_groups = num_nodes // self.num_subvertices
        # perm[s*G + g] = g*S + s : layer-2 rows come out in flatten order.
        perm = jnp.arange(num_nodes).reshape(
            num_groups, self.num_subvertices).T.reshape(-1)
        self._a_hat = a_hat
        self._a2 = jnp.concatenate([a_hat, a_hat[perm]], axis=0)  # (2N, N)
        return a_hat

    def embed(self, x, edge_index=None):
        _, emb = self(x, edge_index)
        return emb

    def __call__(self, x, edge_index=None):
        if edge_index is not None or self._a2 is None:
            assert edge_index is not None, "call set_graph() or pass edge_index"
            self.set_graph(edge_index, x.shape[0])
        out, emb = self._forward(self._a2, x, self.params)
        return out, emb


# ---------------------------------- main -----------------------------------

if __name__ == "__main__":
    num_features = 8
    hidden_dim = 32
    num_vertices = 4
    num_subvertices = 4
    n_nodes = num_vertices * num_subvertices     # 16 graph nodes

    key = jax.random.PRNGKey(0)
    kx, _ = jax.random.split(key)
    x = jax.random.normal(kx, (n_nodes, num_features), jnp.float32)

    # Deterministic undirected ring graph over the 16 nodes (edge_index [2, E]).
    src = jnp.arange(n_nodes, dtype=jnp.int32)
    dst = (src + 1) % n_nodes
    edge_index = jnp.concatenate(
        [jnp.stack([src, dst]), jnp.stack([dst, src])], axis=1)   # [2, 32]

    model = GeneEncoderPallas(num_features, hidden_dim, num_vertices,
                              num_subvertices)
    model.set_graph(edge_index, n_nodes)         # Â built & packed once

    out, embeddings = model(x)
    jax.block_until_ready((out, embeddings))

    # Pure-JAX reference check of the fused kernel (f32 path -> tight tol).
    ref_out, ref_emb = _reference_forward(model._a_hat, x,
                                          model.w1, model.b1,
                                          model.w2, model.b2,
                                          model.w3, model.b3,
                                          num_subvertices)
    assert out.shape == (n_nodes // num_subvertices, hidden_dim)
    assert embeddings.shape == (n_nodes, hidden_dim)
    assert jnp.allclose(out, ref_out, rtol=1e-5, atol=1e-5)
    assert jnp.allclose(embeddings, ref_emb, rtol=1e-5, atol=1e-5)
    print("KERNEL_OK")
</pallas_src>

<mosaic_0001>
module attributes {stable_mosaic.version = 11 : i64} {
  func.func @_gene_encoder_kernel(%arg0: memref<32x16xf32, #tpu.memory_space<vmem>>, %arg1: memref<16x8xf32, #tpu.memory_space<vmem>>, %arg2: memref<176x32xf32, #tpu.memory_space<vmem>>, %arg3: memref<4x128xf32, #tpu.memory_space<vmem>>, %arg4: memref<4x32xf32, #tpu.memory_space<vmem>>) attributes {dimension_semantics = [], scalar_prefetch = 0 : i64, scratch_operands = 0 : i64, tpu.core_type = #tpu.core_type<tc>} {
    %c0 = arith.constant 0 : index
    %c0_0 = arith.constant 0 : index
    %0 = vector.load %arg2[%c0, %c0_0] : memref<176x32xf32, #tpu.memory_space<vmem>>, vector<8x32xf32>
    %c8 = arith.constant 8 : index
    %c0_1 = arith.constant 0 : index
    %1 = vector.load %arg2[%c8, %c0_1] : memref<176x32xf32, #tpu.memory_space<vmem>>, vector<32x32xf32>
    %c40 = arith.constant 40 : index
    %c0_2 = arith.constant 0 : index
    %2 = vector.load %arg2[%c40, %c0_2] : memref<176x32xf32, #tpu.memory_space<vmem>>, vector<128x32xf32>
    %c168 = arith.constant 168 : index
    %c0_3 = arith.constant 0 : index
    %3 = vector.load %arg2[%c168, %c0_3] : memref<176x32xf32, #tpu.memory_space<vmem>>, vector<1x32xf32>
    %c169 = arith.constant 169 : index
    %c0_4 = arith.constant 0 : index
    %4 = vector.load %arg2[%c169, %c0_4] : memref<176x32xf32, #tpu.memory_space<vmem>>, vector<1x32xf32>
    %c170 = arith.constant 170 : index
    %c0_5 = arith.constant 0 : index
    %5 = vector.load %arg2[%c170, %c0_5] : memref<176x32xf32, #tpu.memory_space<vmem>>, vector<1x32xf32>
    %c0_6 = arith.constant 0 : index
    %c0_7 = arith.constant 0 : index
    %6 = vector.load %arg0[%c0_6, %c0_7] : memref<32x16xf32, #tpu.memory_space<vmem>>, vector<16x16xf32>
    %c16 = arith.constant 16 : index
    %c0_8 = arith.constant 0 : index
    %7 = vector.load %arg0[%c16, %c0_8] : memref<32x16xf32, #tpu.memory_space<vmem>>, vector<16x16xf32>
    %c0_9 = arith.constant 0 : index
    %c0_10 = arith.constant 0 : index
    %8 = vector.load %arg1[%c0_9, %c0_10] : memref<16x8xf32, #tpu.memory_space<vmem>>, vector<16x8xf32>
    %cst = arith.constant dense<0.000000e+00> : vector<16x32xf32>
    %9 = tpu.matmul %8, %0, %cst {dimension_numbers = #tpu.dot_dimension_numbers<[1], [0], [0], [1], [0, 0, 1, 1], [], []>} : vector<16x8xf32>, vector<8x32xf32>, vector<16x32xf32> -> vector<16x32xf32>
    %cst_11 = arith.constant dense<0.000000e+00> : vector<16x32xf32>
    %10 = tpu.matmul %6, %9, %cst_11 {dimension_numbers = #tpu.dot_dimension_numbers<[1], [0], [0], [1], [0, 0, 1, 1], [], []>} : vector<16x16xf32>, vector<16x32xf32>, vector<16x32xf32> -> vector<16x32xf32>
    %11 = vector.broadcast %3 : vector<1x32xf32> to vector<16x32xf32>
    %12 = arith.addf %10, %11 : vector<16x32xf32>
    %cst_12 = arith.constant 0.000000e+00 : f32
    %13 = vector.broadcast %cst_12 : f32 to vector<16x32xf32>
    %14 = arith.maximumf %12, %13 : vector<16x32xf32>
    %cst_13 = arith.constant dense<0.000000e+00> : vector<16x32xf32>
    %15 = tpu.matmul %14, %1, %cst_13 {dimension_numbers = #tpu.dot_dimension_numbers<[1], [0], [0], [1], [0, 0, 1, 1], [], []>} : vector<16x32xf32>, vector<32x32xf32>, vector<16x32xf32> -> vector<16x32xf32>
    %cst_14 = arith.constant dense<0.000000e+00> : vector<16x32xf32>
    %16 = tpu.matmul %7, %15, %cst_14 {dimension_numbers = #tpu.dot_dimension_numbers<[1], [0], [0], [1], [0, 0, 1, 1], [], []>} : vector<16x16xf32>, vector<16x32xf32>, vector<16x32xf32> -> vector<16x32xf32>
    %17 = vector.broadcast %4 : vector<1x32xf32> to vector<16x32xf32>
    %18 = arith.addf %16, %17 : vector<16x32xf32>
    %19 = vector.extract_strided_slice %18 {offsets = [0, 0], sizes = [4, 32], strides = [1, 1]} : vector<16x32xf32> to vector<4x32xf32>
    %c0_15 = arith.constant 0 : index
    %c0_16 = arith.constant 0 : index
    %20 = vector.load %arg3[%c0_15, %c0_16] : memref<4x128xf32, #tpu.memory_space<vmem>>, vector<4x32xf32>
    tpu.vector_store %arg3[%c0_15, %c0_16], %19 {strides = array<i32>} : memref<4x128xf32, #tpu.memory_space<vmem>>, vector<4x32xf32>,
    %21 = vector.extract_strided_slice %18 {offsets = [4, 0], sizes = [4, 32], strides = [1, 1]} : vector<16x32xf32> to vector<4x32xf32>
    %c0_17 = arith.constant 0 : index
    %c32 = arith.constant 32 : index
    %22 = vector.load %arg3[%c0_17, %c32] : memref<4x128xf32, #tpu.memory_space<vmem>>, vector<4x32xf32>
    tpu.vector_store %arg3[%c0_17, %c32], %21 {strides = array<i32>} : memref<4x128xf32, #tpu.memory_space<vmem>>, vector<4x32xf32>,
    %23 = vector.extract_strided_slice %18 {offsets = [8, 0], sizes = [4, 32], strides = [1, 1]} : vector<16x32xf32> to vector<4x32xf32>
    %c0_18 = arith.constant 0 : index
    %c64 = arith.constant 64 : index
    %24 = vector.load %arg3[%c0_18, %c64] : memref<4x128xf32, #tpu.memory_space<vmem>>, vector<4x32xf32>
    tpu.vector_store %arg3[%c0_18, %c64], %23 {strides = array<i32>} : memref<4x128xf32, #tpu.memory_space<vmem>>, vector<4x32xf32>,
    %25 = vector.extract_strided_slice %18 {offsets = [12, 0], sizes = [4, 32], strides = [1, 1]} : vector<16x32xf32> to vector<4x32xf32>
    %c0_19 = arith.constant 0 : index
    %c96 = arith.constant 96 : index
    %26 = vector.load %arg3[%c0_19, %c96] : memref<4x128xf32, #tpu.memory_space<vmem>>, vector<4x32xf32>
    tpu.vector_store %arg3[%c0_19, %c96], %25 {strides = array<i32>} : memref<4x128xf32, #tpu.memory_space<vmem>>, vector<4x32xf32>,
    %c0_20 = arith.constant 0 : index
    %c0_21 = arith.constant 0 : index
    %27 = vector.load %arg3[%c0_20, %c0_21] : memref<4x128xf32, #tpu.memory_space<vmem>>, vector<4x128xf32>
    %cst_22 = arith.constant dense<0.000000e+00> : vector<4x32xf32>
    %28 = tpu.matmul %27, %2, %cst_22 {dimension_numbers = #tpu.dot_dimension_numbers<[1], [0], [0], [1], [0, 0, 1, 1], [], []>} : vector<4x128xf32>, vector<128x32xf32>, vector<4x32xf32> -> vector<4x32xf32>
    %29 = vector.broadcast %5 : vector<1x32xf32> to vector<4x32xf32>
    %30 = arith.addf %28, %29 : vector<4x32xf32>
    %c0_23 = arith.constant 0 : index
    %c0_24 = arith.constant 0 : index
    %31 = vector.load %arg4[%c0_23, %c0_24] : memref<4x32xf32, #tpu.memory_space<vmem>>, vector<4x32xf32>
    tpu.vector_store %arg4[%c0_23, %c0_24], %30 {strides = array<i32>} : memref<4x32xf32, #tpu.memory_space<vmem>>, vector<4x32xf32>,
    return
  }
}

</mosaic_0001>

<bundles_post_ra>
// kernel: gene_encoder_forward.1
= control target key start
LH: loop header
LB: loop body
LE: loop exit
PB: predicated region body
PF: predicated region fallthrough
CT: control target
= control target key end

     0   :  { %vm47_vm0 = vcmask 64512   ;;  %s833_s0 = inlined_call_operand.vmem [shape: f32[32,16], index: 0, kind: input, shape index: {}]   ;;  %s834_s1 = inlined_call_operand.vmem [shape: f32[16,8], index: 1, kind: input, shape index: {}]   ;;  %s835_s2 = inlined_call_operand.vmem [shape: f32[176,32], index: 2, kind: input, shape index: {}]   ;;  %s836_s3 = inlined_call_operand.vmem [shape: f32[4,128], index: 3, kind: output, shape index: {0}]   ;;  %s837_s4 = inlined_call_operand.hbm [shape: f32[4,32], index: 4, kind: output, shape index: {1}]  }
   0x1   :  { %v17_v0 = vld [vmem:[%s835_s2] sm:$0xff]  ;;  %v46_v2 = vld [vmem:[%s834_s1 + $0x8] sm:$0xff] }
   0x2   :  { %v45_v1 = vld [vmem:[%s834_s1] sm:$0xff]  ;;  %542 = vmatprep.subr.mxu0 %v17_v0 }
   0x3   :  { %544 = vmatprep.mubr.msk.f32.mxu0 %vm47_vm0, %v45_v1 }
   0x4   :  { %10 = vsyncpa [#allocation3], 0  ;;  %543 = vmatpush3.msra.mxu0 %v17_v0  ;;  %v41_v3 = vld [vmem:[%s833_s0] sm:$0xff]  ;;  %vm133_vm1 = vcmask 130048   ;;  %v18_v4 = vld [vmem:[%s835_s2 + $0x8] sm:$0xff]  ;;  %vm217_vm2 = vcmask 261120  }
   0x5   :  { %545 = vmatmul.mubr.msk.f32.vlgmr.msra.gmra.mrb[0].mxu0 %vm47_vm0, %v46_v2  ;;  %v19_v5 = vld [vmem:[%s835_s2 + $0x10] sm:$0xff]  ;;  %v42_v10 = vld [vmem:[%s833_s0 + $0x8] sm:$0xff]  ;;  %v20_v11 = vld [vmem:[%s835_s2 + $0x18] sm:$0xff]  ;;  %v678_v29 = vmov 0.0|0.0   ;;  %vm679_vm3 = vmmov 0   ;;  %v680_v51 = vmov 0.0  }
   0x6   :  { %551 = vmatprep.mubr.msk.f32.mxu0 %vm133_vm1, %v41_v3  ;;  %v611_v9 = vpack.c.bf16 %v19_v5, %v18_v4  ;;  %v21_v12 = vld [vmem:[%s835_s2 + $0x20] sm:$0xff]  ;;  %v499_v14 = vld [vmem:[%s835_s2 + $0xa8] ss:$0 sm:$0xff]  ;;  %v43_v21 = vld [vmem:[%s833_s0 + $0x10] sm:$0xff]  ;;  %623 = vmatprep.subr.bf16.mxu1 %v678_v29  ;;  %vm384_vm4 = vcmask 257024   ;;  %s681_s18 = smov 96  }
   0x7   :  { %v615_v13 = vpack.c.bf16 %v21_v12, %v20_v11  ;;  %v44_v25 = vld [vmem:[%s833_s0 + $0x18] sm:$0xff]  ;;  %v22_v26 = vld [vmem:[%s835_s2 + $0x28] sm:$0xff]  ;;  %v23_v27 = vld [vmem:[%s835_s2 + $0x30] sm:$0xff]  ;;  %604 = vmatprep.mubr.msk.f32.mxu1 %vm679_vm3, %v680_v51  ;;  %s682_s20 = smov 32   ;;  %s683_s21 = smov 64   ;;  %vm390_vm5 = vcmask 523524  }
   0x8   :  { %v24_v28 = vld [vmem:[%s835_s2 + $0x38] sm:$0xff]  ;;  %v624_v30 = vpack.c.bf16 %v23_v27, %v22_v26  ;;  %v25_v31 = vld [vmem:[%s835_s2 + $0x40] sm:$0xff]  ;;  %v26_v33 = vld [vmem:[%s835_s2 + $0x48] sm:$0xff]  ;;  %vm396_vm6 = vcmask 781824   ;;  %vm401_vm7 = vcmask 1048324   ;;  %s684_s5 = smov [#allocation2]  }
   0x9   :  { %v627_v32 = vpack.c.bf16 %v25_v31, %v24_v28  ;;  %v27_v34 = vld [vmem:[%s835_s2 + $0x50] sm:$0xff]  ;;  %v28_v36 = vld [vmem:[%s835_s2 + $0x58] sm:$0xff]  ;;  %v29_v37 = vld [vmem:[%s835_s2 + $0x60] sm:$0xff]  ;;  %s487_s6 = sshll.u32 %s684_s5, 4  ;;  %s488_s6 = int_to_ptr.vmem [resolvable:$true] %s487_s6 }
   0xa   :  { %625 = vmatpush3.bf16.msra.mxu1 %v624_v30  ;;  %v630_v35 = vpack.c.bf16 %v27_v34, %v26_v33  ;;  %v633_v38 = vpack.c.bf16 %v29_v37, %v28_v36  ;;  %v30_v39 = vld [vmem:[%s835_s2 + $0x68] sm:$0xff]  ;;  %v31_v40 = vld [vmem:[%s835_s2 + $0x70] sm:$0xff]  ;;  %v32_v42 = vld [vmem:[%s835_s2 + $0x78] sm:$0xff]  ;;  %s654_s7 = scalar_lea.vmem %s488_s6, 64  ;;  %p659_p1 = scmp.lt.s32.totalorder %s488_s6, %s488_s6 }
   0xb   :  { %626 = vmatprep.subr.bf16.mxu1 %v678_v29  ;;  %v636_v41 = vpack.c.bf16 %v31_v40, %v30_v39  ;;  %v33_v43 = vld [vmem:[%s835_s2 + $0x80] sm:$0xff]  ;;  %v34_v45 = vld [vmem:[%s835_s2 + $0x88] sm:$0xff]  ;;  %v35_v46 = vld [vmem:[%s835_s2 + $0x90] sm:$0xff]  ;;  %p655_p0 = scmp.ne.s32.totalorder %s488_s6, %s654_s7  ;;  %p660_p2 = scmp.lt.s32.totalorder %s654_s7, %s654_s7 }
   0xc   :  { %v639_v44 = vpack.c.bf16 %v33_v43, %v32_v42  ;;  %v642_v47 = vpack.c.bf16 %v35_v46, %v34_v45  ;;  %v36_v48 = vld [vmem:[%s835_s2 + $0x98] sm:$0xff]  ;;  %v37_v49 = vld [vmem:[%s835_s2 + $0xa0] sm:$0xff]  ;;  %v504_v52 = vld [vmem:[%s835_s2 + $0xa9] ss:$0 sm:$0xff] }
   0xd   :  { %v645_v50 = vpack.c.bf16 %v37_v49, %v36_v48  ;;  %v507_v61 = vld [vmem:[%s835_s2 + $0xaa] ss:$0 sm:$0xff]  ;;  %p661_p3 = por %p660_p2, %p659_p1 }
   0xe   :  { %628 = vmatpush3.bf16.msra.mxu1 %v627_v32 }
   0xf   :  { %629 = vmatprep.subr.bf16.mxu1 %v678_v29  ;;  %p662_p4 = pnand %p661_p3, %p655_p0 }
  0x12   :  { %631 = vmatpush3.bf16.msra.mxu1 %v630_v35 }
  0x13   :  { %632 = vmatprep.subr.bf16.mxu1 %v678_v29 }
  0x16   :  { %634 = vmatpush3.bf16.msra.mxu1 %v633_v38 }
  0x17   :  { %635 = vmatprep.subr.bf16.mxu1 %v678_v29 }
  0x1a   :  { %637 = vmatpush3.bf16.msra.mxu1 %v636_v41 }
  0x1b   :  { %638 = vmatprep.subr.bf16.mxu1 %v678_v29 }
  0x1e   :  { %640 = vmatpush3.bf16.msra.mxu1 %v639_v44 }
  0x1f   :  { %641 = vmatprep.subr.bf16.mxu1 %v678_v29 }
  0x22   :  { %643 = vmatpush3.bf16.msra.mxu1 %v642_v47 }
  0x23   :  { %644 = vmatprep.subr.bf16.mxu1 %v678_v29 }
  0x26   :  { %646 = vmatpush3.bf16.msra.mxu1 %v645_v50 }
  0xd8   :  { %v546_v6 = vpop.f32.mrb[0].mxu0 }
  0xd9   :  { %v120_v7 = vpop.f32.mrb[1].mxu0 }
  0xda   :  { %v607_v8 = vpack.c.bf16 %v546_v6, %v120_v7 }
  0xdc   :  { %608 = vmatprep.subr.bf16.mxu0 %v607_v8 }
  0xdd   :  { %610 = vmatpush3.bf16.msra.mxu0 %v607_v8 }
  0xde   :  { %612 = vmatprep.subr.bf16.mxu0 %v611_v9 }
  0xe0   :  { %552 = vmatmul.mubr.msk.f32.vlgmr.msra.gmra.mrb[2].mxu0 %vm133_vm1, %v42_v10 }
  0xe1   :  { %614 = vmatpush3.bf16.msra.mxu0 %v611_v9 }
  0xe2   :  { %616 = vmatprep.subr.bf16.mxu0 %v615_v13 }
  0xe5   :  { %618 = vmatpush3.bf16.msra.mxu0 %v615_v13 }
 0x1b3   :  { %v553_v15 = vpop.f32.mrb[2].mxu0 }
 0x1b4   :  { %v212_v16 = vadd.f32 %v553_v15, %v499_v14  ;;  %v206_v17 = vpop.f32.mrb[3].mxu0 }
 0x1b5   :  { %v207_v18 = vadd.f32 %v499_v14, %v206_v17 }
 0x1b6   :  { %v216_v20 = vmax.f32 %v212_v16, 0.0 }
 0x1b7   :  { %v215_v19 = vmax.f32 %v207_v18, 0.0 }
 0x1b9   :  { %562 = vmatprep.mubr.msk.f32.mxu0 %vm217_vm2, %v215_v19 }
 0x1ba   :  { %563 = vmatmul.mubr.msk.f32.vlgmr.msra.gmra.mrb[4].mxu0 %vm217_vm2, %v216_v20 }
 0x1bb   :  { %569 = vmatprep.mubr.msk.f32.mxu0 %vm133_vm1, %v43_v21 }
 0x28d   :  { %v564_v22 = vpop.f32.mrb[4].mxu0 }
 0x28e   :  { %v290_v23 = vpop.f32.mrb[5].mxu0 }
 0x28f   :  { %v619_v24 = vpack.c.bf16 %v564_v22, %v290_v23 }
 0x291   :  { %620 = vmatprep.subr.bf16.mxu0 %v619_v24 }
 0x292   :  { %622 = vmatpush3.bf16.msra.mxu0 %v619_v24 }
 0x295   :  { %570 = vmatmul.mubr.msk.f32.vlgmr.msra.gmra.mrb[6].mxu0 %vm133_vm1, %v44_v25 }
 0x368   :  { %v571_v53 = vpop.f32.mrb[6].mxu0 }
 0x369   :  { %v381_v54 = vadd.f32 %v571_v53, %v504_v52  ;;  %v375_v55 = vpop.f32.mrb[7].mxu0 }
 0x36a   :  { %v376_v56 = vadd.f32 %v504_v52, %v375_v55 }
 0x36b   :  { %398 = vrot.lane.b32.xlu1 %v381_v54, %s681_s18 }
 0x36c   :  { %385 = vst.msk [vmem:[%s836_s3] sm:$0xf] %vm384_vm4, %v376_v56  ;;  %387 = vrot.lane.b32.xlu0 %v376_v56, %s682_s20 }
 0x370   :  { %393 = vrot.lane.b32.xlu0 %v381_v54, %s683_s21 }
 0x3dd   :  { %v399_v59 = vpop.permute.xlu1 %398 }
 0x3de   :  { %v388_v57 = vpop.permute.xlu0 %387 }
 0x3df   :  { %391 = vst.msk [vmem:[%s836_s3 - $0x4] sm:$0xf0] %vm390_vm5, %v388_v57 }
 0x3e2   :  { %v394_v58 = vpop.permute.xlu0 %393 }
 0x3e3   :  { %397 = vst.msk [vmem:[%s836_s3] sm:$0xf] %vm396_vm6, %v394_v58 }
 0x3e4   :  { %402 = vst.msk [vmem:[%s836_s3 - $0x4] sm:$0xf0] %vm401_vm7, %v399_v59 }
 0x3eb   :  { %v403_v60 = vld [vmem:[%s836_s3] sm:$0xf] }
 0x3ec   :  { %605 = vmatmul.mubr.f32.vlgmr.msra.gmra.mrb[0].mxu1 %v403_v60 }
 0x4bf   :  { %v474_v62 = vpop.f32.mrb[0].mxu1 }
 0x4c0   :  { %v475_v63 = vadd.f32 %v507_v61, %v474_v62  ;;  %v606_v0 = vpop.f32.mrb[1].mxu1 }
 0x4c2   :  { %478 = vst.msk [vmem:[#allocation2] sm:$0xf] %vm384_vm4, %v475_v63 }
 0x4c3   :  { %665 = shalt.err (!%p662_p4)
}
 0x4c4   :  { %s666_s9 = scalar_lea.hbm %s837_s4, 64 }
 0x4c5   :  { %p667_p5 = scmp.ne.s32.totalorder %s837_s4, %s666_s9  ;;  %p670_p6 = scmp.lt.u32.totalorder %s666_s9, %s837_s4 }
 0x4c7   :  { %p672_p7 = pnand %p670_p6, %p667_p5 }
 0x4c9   :  { %675 = shalt.err (!%p672_p7)
}
 0x4ca   :  { %490 = dma.vmem_to_hbm [thread:$0]  %s488_s6, 64, %s837_s4, [#allocation3]  }
 0x4cb   :  { %676 = dma.done.wait [#allocation3], 64  }
 0x4cc   :  { %677 = vsyncadd [#allocation3], 4294967232 }
 0x4cd   :  { %496 = vsyncpa [#allocation3], 1 }

</bundles_post_ra>
